<compile_context>
chip_gen: v7x
topology: tpu7x:2x2x1
jax: 0.10.0
libtpu: 0.0.40
codegen_flags: <defaults>
</compile_context>

<pallas_src>
import functools

import jax
import jax.numpy as jnp
from jax.experimental import pallas as pl
from jax.experimental.pallas import tpu as pltpu


def _round_up(n, m):
    return ((n + m - 1) // m) * m


def _fused_mlp_kernel(*refs, num_layers, use_sigmoid, matmul_dtype):
    """Fused MLP body: x_ref, w_0..w_{L-1}, b_0..b_{L-1}, o_ref.

    Weights/biases are whole-array resident VMEM blocks; x/o are batch tiles.
    Matmuls run with `matmul_dtype` operands and f32 accumulation; all post-matmul
    elementwise math stays in f32.
    """
    x_ref = refs[0]
    w_refs = refs[1 : 1 + num_layers]
    b_refs = refs[1 + num_layers : 1 + 2 * num_layers]
    o_ref = refs[1 + 2 * num_layers]

    h = x_ref[...]
    for li in range(num_layers):
        lhs = h.astype(matmul_dtype)
        rhs = w_refs[li][...].astype(matmul_dtype)     # no-op cast (stored in matmul_dtype)
        h = jnp.dot(lhs, rhs, preferred_element_type=jnp.float32)
        h = h + b_refs[li][...].astype(jnp.float32)    # (tb, Dout) + (1, Dout) broadcast
        if li < num_layers - 1:
            h = jnp.maximum(h, 0.0)                    # ReLU on hidden layers
        elif use_sigmoid:
            h = jax.nn.sigmoid(h)                      # optional sigmoid on output (f32 EUP)
    o_ref[...] = h.astype(o_ref.dtype)                 # true-width (unpadded) output store


def linear_net_forward(params, x, use_sigmoid=False, *,
                       max_batch_tile=4096, matmul_dtype=jnp.bfloat16):
    """Forward pass of LinearNet as a single fused Pallas kernel, tiled over batch."""
    num_layers = len(params)
    B, din = x.shape
    out_dim = params[-1][0].shape[1]

    # ---- Param prep: pad hidden widths to 128 lanes, keep Din / final out width exact. ----
    prepped = []
    in_w = din
    for li, (w, b) in enumerate(params):
        fan_in, fan_out = w.shape
        pad_in = in_w - fan_in                                  # match previous padded width
        out_w = fan_out if li == num_layers - 1 else _round_up(fan_out, 128)
        pad_out = out_w - fan_out
        if pad_in or pad_out:
            w = jnp.pad(w, ((0, pad_in), (0, pad_out)))
            b = jnp.pad(b, ((0, 0), (0, pad_out)))
        prepped.append((w.astype(matmul_dtype), b.astype(jnp.float32)))
        in_w = out_w

    # ---- Batch tiling: big tiles, minimal padding, >=2 parallel steps for v7x megacore. ----
    sub = 16 if jnp.dtype(x.dtype).itemsize < 4 else 8          # sublane granularity
    num_steps = max(1, pl.cdiv(B, max_batch_tile))
    if num_steps == 1 and B >= 256:
        num_steps = 2        # v7x: shard the "parallel" batch axis across both TensorCores
    tb = _round_up(pl.cdiv(B, num_steps), sub)
    grid_n = pl.cdiv(B, tb)
    b_pad = tb * grid_n
    x_p = x if b_pad == B else jnp.pad(x, ((0, b_pad - B), (0, 0)))

    ws = [w for (w, _) in prepped]
    bs = [b for (_, b) in prepped]

    in_specs = [pl.BlockSpec((tb, din), lambda i: (i, 0))]
    # Whole-array weight/bias blocks with constant index_maps -> resident in VMEM, DMA'd once.
    in_specs += [pl.BlockSpec(w.shape, lambda i: (0, 0)) for w in ws]
    in_specs += [pl.BlockSpec(b.shape, lambda i: (0, 0)) for b in bs]

    # Explicit VMEM budget: double-buffered x/out tiles + resident (double-buffered) weights
    # + f32 activation scratch slack.
    itemsize = jnp.dtype(x.dtype).itemsize
    max_width = max([din] + [w.shape[1] for w in ws])
    vmem_needed = (2 * tb * (din + out_dim) * itemsize
                   + 2 * sum(w.size * w.dtype.itemsize + b.size * b.dtype.itemsize
                             for w, b in prepped)
                   + 4 * tb * max_width * 4)
    vmem_limit = int(min(max(vmem_needed + (4 << 20), 16 << 20), 64 << 20))

    out = pl.pallas_call(
        functools.partial(_fused_mlp_kernel, num_layers=num_layers,
                          use_sigmoid=use_sigmoid, matmul_dtype=matmul_dtype),
        out_shape=jax.ShapeDtypeStruct((b_pad, out_dim), x.dtype),
        grid=(grid_n,),
        in_specs=in_specs,
        out_specs=pl.BlockSpec((tb, out_dim), lambda i: (i, 0)),
        compiler_params=pltpu.CompilerParams(
            dimension_semantics=("parallel",),      # shard batch tiles across TCs on v7x
            vmem_limit_bytes=vmem_limit,
        ),
    )(x_p, *ws, *bs)

    return out[:B]


def init_linear_net_params(key, architecture):
    """Deterministic init matching nn.Linear default: U(-1/sqrt(fan_in), 1/sqrt(fan_in))."""
    params = []
    for i in range(1, len(architecture)):
        fan_in, fan_out = architecture[i - 1], architecture[i]
        key, kw, kb = jax.random.split(key, 3)
        bound = 1.0 / jnp.sqrt(jnp.float32(fan_in))
        # stored already transposed: (in, out)
        w = jax.random.uniform(kw, (fan_in, fan_out), jnp.float32, -bound, bound)
        b = jax.random.uniform(kb, (1, fan_out), jnp.float32, -bound, bound)
        params.append((w, b))
    return params


if __name__ == "__main__":
    # architecture = [in, hidden, hidden, out]
    architecture = (32, 64, 64, 8)
    use_sigmoid = True
    batch = 8

    key = jax.random.PRNGKey(0)
    key, kx = jax.random.split(key)
    x = jax.random.normal(kx, (batch, architecture[0]), jnp.float32)

    params = init_linear_net_params(key, architecture)

    fwd = jax.jit(functools.partial(linear_net_forward, use_sigmoid=use_sigmoid))
    out = jax.block_until_ready(fwd(params, x))

    # sanity: shape & sigmoid range
    assert out.shape == (batch, architecture[-1])
    assert bool(jnp.all(out >= 0.0)) and bool(jnp.all(out <= 1.0))

    # reference in plain JAX, mirroring the kernel's bf16-operand / f32-accumulate matmuls
    ref = x
    for li, (w, b) in enumerate(params):
        ref = jnp.dot(ref.astype(jnp.bfloat16), w.astype(jnp.bfloat16),
                      preferred_element_type=jnp.float32) + b
        if li < len(params) - 1:
            ref = jnp.maximum(ref, 0.0)
    if use_sigmoid:
        ref = jax.nn.sigmoid(ref)
    assert bool(jnp.allclose(out, ref, atol=1e-4, rtol=1e-4))

    print("KERNEL_OK")
</pallas_src>

<mosaic_0001>
module attributes {stable_mosaic.version = 11 : i64} {
  func.func @_fused_mlp_kernel(%arg0: i32, %arg1: memref<8x32xf32, #tpu.memory_space<vmem>>, %arg2: memref<32x128xbf16, #tpu.memory_space<vmem>>, %arg3: memref<128x128xbf16, #tpu.memory_space<vmem>>, %arg4: memref<128x8xbf16, #tpu.memory_space<vmem>>, %arg5: memref<1x128xf32, #tpu.memory_space<vmem>>, %arg6: memref<1x128xf32, #tpu.memory_space<vmem>>, %arg7: memref<1x8xf32, #tpu.memory_space<vmem>>, %arg8: memref<8x8xf32, #tpu.memory_space<vmem>>) attributes {dimension_semantics = [#tpu.dimension_semantics<parallel>], iteration_bounds = array<i64: 1>, scalar_prefetch = 0 : i64, scratch_operands = 0 : i64, tpu.core_type = #tpu.core_type<tc>, window_params = [{transform_indices = @transform_0, window_bounds = array<i64: 8, 32>}, {pipeline_mode = #tpu.pipeline_mode<synchronous>, transform_indices = @transform_1, window_bounds = array<i64: 32, 128>}, {pipeline_mode = #tpu.pipeline_mode<synchronous>, transform_indices = @transform_2, window_bounds = array<i64: 128, 128>}, {pipeline_mode = #tpu.pipeline_mode<synchronous>, transform_indices = @transform_3, window_bounds = array<i64: 128, 8>}, {pipeline_mode = #tpu.pipeline_mode<synchronous>, transform_indices = @transform_4, window_bounds = array<i64: 1, 128>}, {pipeline_mode = #tpu.pipeline_mode<synchronous>, transform_indices = @transform_5, window_bounds = array<i64: 1, 128>}, {pipeline_mode = #tpu.pipeline_mode<synchronous>, transform_indices = @transform_6, window_bounds = array<i64: 1, 8>}, {transform_indices = @transform_7, window_bounds = array<i64: 8, 8>}]} {
    %c0 = arith.constant 0 : index
    %c0_0 = arith.constant 0 : index
    %0 = vector.load %arg1[%c0, %c0_0] : memref<8x32xf32, #tpu.memory_space<vmem>>, vector<8x32xf32>
    %1 = arith.truncf %0 : vector<8x32xf32> to vector<8x32xbf16>
    %c0_1 = arith.constant 0 : index
    %c0_2 = arith.constant 0 : index
    %2 = vector.load %arg2[%c0_1, %c0_2] : memref<32x128xbf16, #tpu.memory_space<vmem>>, vector<32x128xbf16>
    %cst = arith.constant dense<0.000000e+00> : vector<8x128xf32>
    %3 = tpu.matmul %1, %2, %cst {dimension_numbers = #tpu.dot_dimension_numbers<[1], [0], [0], [1], [0, 0, 1, 1], [], []>} : vector<8x32xbf16>, vector<32x128xbf16>, vector<8x128xf32> -> vector<8x128xf32>
    %c0_3 = arith.constant 0 : index
    %c0_4 = arith.constant 0 : index
    %4 = vector.load %arg5[%c0_3, %c0_4] : memref<1x128xf32, #tpu.memory_space<vmem>>, vector<1x128xf32>
    %5 = vector.broadcast %4 : vector<1x128xf32> to vector<8x128xf32>
    %6 = arith.addf %3, %5 : vector<8x128xf32>
    %cst_5 = arith.constant 0.000000e+00 : f32
    %7 = vector.broadcast %cst_5 : f32 to vector<8x128xf32>
    %8 = arith.maximumf %6, %7 : vector<8x128xf32>
    %9 = arith.truncf %8 : vector<8x128xf32> to vector<8x128xbf16>
    %c0_6 = arith.constant 0 : index
    %c0_7 = arith.constant 0 : index
    %10 = vector.load %arg3[%c0_6, %c0_7] : memref<128x128xbf16, #tpu.memory_space<vmem>>, vector<128x128xbf16>
    %cst_8 = arith.constant dense<0.000000e+00> : vector<8x128xf32>
    %11 = tpu.matmul %9, %10, %cst_8 {dimension_numbers = #tpu.dot_dimension_numbers<[1], [0], [0], [1], [0, 0, 1, 1], [], []>} : vector<8x128xbf16>, vector<128x128xbf16>, vector<8x128xf32> -> vector<8x128xf32>
    %c0_9 = arith.constant 0 : index
    %c0_10 = arith.constant 0 : index
    %12 = vector.load %arg6[%c0_9, %c0_10] : memref<1x128xf32, #tpu.memory_space<vmem>>, vector<1x128xf32>
    %13 = vector.broadcast %12 : vector<1x128xf32> to vector<8x128xf32>
    %14 = arith.addf %11, %13 : vector<8x128xf32>
    %cst_11 = arith.constant 0.000000e+00 : f32
    %15 = vector.broadcast %cst_11 : f32 to vector<8x128xf32>
    %16 = arith.maximumf %14, %15 : vector<8x128xf32>
    %17 = arith.truncf %16 : vector<8x128xf32> to vector<8x128xbf16>
    %c0_12 = arith.constant 0 : index
    %c0_13 = arith.constant 0 : index
    %18 = vector.load %arg4[%c0_12, %c0_13] : memref<128x8xbf16, #tpu.memory_space<vmem>>, vector<128x8xbf16>
    %cst_14 = arith.constant dense<0.000000e+00> : vector<8x8xf32>
    %19 = tpu.matmul %17, %18, %cst_14 {dimension_numbers = #tpu.dot_dimension_numbers<[1], [0], [0], [1], [0, 0, 1, 1], [], []>} : vector<8x128xbf16>, vector<128x8xbf16>, vector<8x8xf32> -> vector<8x8xf32>
    %c0_15 = arith.constant 0 : index
    %c0_16 = arith.constant 0 : index
    %20 = vector.load %arg7[%c0_15, %c0_16] : memref<1x8xf32, #tpu.memory_space<vmem>>, vector<1x8xf32>
    %21 = vector.broadcast %20 : vector<1x8xf32> to vector<8x8xf32>
    %22 = arith.addf %19, %21 : vector<8x8xf32>
    %23 = arith.negf %22 : vector<8x8xf32>
    %24 = math.exp %23 : vector<8x8xf32>
    %cst_17 = arith.constant 1.000000e+00 : f32
    %25 = vector.broadcast %cst_17 : f32 to vector<8x8xf32>
    %26 = arith.addf %25, %24 : vector<8x8xf32>
    %27 = arith.divf %25, %26 : vector<8x8xf32>
    %c0_18 = arith.constant 0 : index
    %c0_19 = arith.constant 0 : index
    %28 = vector.load %arg8[%c0_18, %c0_19] : memref<8x8xf32, #tpu.memory_space<vmem>>, vector<8x8xf32>
    tpu.vector_store %arg8[%c0_18, %c0_19], %27 {strides = array<i32>} : memref<8x8xf32, #tpu.memory_space<vmem>>, vector<8x8xf32>,
    return
  }
  func.func @transform_0(%arg0: i32) -> (i32, i32) {
    %c0_i32 = arith.constant 0 : i32
    %c0_i32_0 = arith.constant 0 : i32
    return %arg0, %c0_i32 : i32, i32
  }
  func.func @transform_1(%arg0: i32) -> (i32, i32) {
    %c0_i32 = arith.constant 0 : i32
    %c0_i32_0 = arith.constant 0 : i32
    %c0_i32_1 = arith.constant 0 : i32
    return %c0_i32, %c0_i32_0 : i32, i32
  }
  func.func @transform_2(%arg0: i32) -> (i32, i32) {
    %c0_i32 = arith.constant 0 : i32
    %c0_i32_0 = arith.constant 0 : i32
    %c0_i32_1 = arith.constant 0 : i32
    return %c0_i32, %c0_i32_0 : i32, i32
  }
  func.func @transform_3(%arg0: i32) -> (i32, i32) {
    %c0_i32 = arith.constant 0 : i32
    %c0_i32_0 = arith.constant 0 : i32
    %c0_i32_1 = arith.constant 0 : i32
    return %c0_i32, %c0_i32_0 : i32, i32
  }
  func.func @transform_4(%arg0: i32) -> (i32, i32) {
    %c0_i32 = arith.constant 0 : i32
    %c0_i32_0 = arith.constant 0 : i32
    %c0_i32_1 = arith.constant 0 : i32
    return %c0_i32, %c0_i32_0 : i32, i32
  }
  func.func @transform_5(%arg0: i32) -> (i32, i32) {
    %c0_i32 = arith.constant 0 : i32
    %c0_i32_0 = arith.constant 0 : i32
    %c0_i32_1 = arith.constant 0 : i32
    return %c0_i32, %c0_i32_0 : i32, i32
  }
  func.func @transform_6(%arg0: i32) -> (i32, i32) {
    %c0_i32 = arith.constant 0 : i32
    %c0_i32_0 = arith.constant 0 : i32
    %c0_i32_1 = arith.constant 0 : i32
    return %c0_i32, %c0_i32_0 : i32, i32
  }
  func.func @transform_7(%arg0: i32) -> (i32, i32) {
    %c0_i32 = arith.constant 0 : i32
    %c0_i32_0 = arith.constant 0 : i32
    return %arg0, %c0_i32 : i32, i32
  }
}

</mosaic_0001>

<bundles_post_ra>
// kernel: linear_net_forward.1
= control target key start
LH: loop header
LB: loop body
LE: loop exit
PB: predicated region body
PF: predicated region fallthrough
CT: control target
= control target key end

     0   :  { %v486_v1 = vmov 0.0   ;;  %vm487_vm0 = vmmov 0   ;;  %vm53_vm1 = vcmask 261120   ;;  %s631_s0 = inlined_call_operand.vmem [shape: f32[8,32], index: 0, kind: input, shape index: {}]   ;;  %s632_s1 = inlined_call_operand.vmem [shape: bf16[32,128], index: 1, kind: input, shape index: {}]   ;;  %s633_s2 = inlined_call_operand.vmem [shape: bf16[128,128], index: 2, kind: input, shape index: {}]   ;;  %s634_s3 = inlined_call_operand.vmem [shape: bf16[128,8], index: 3, kind: input, shape index: {}]   ;;  %s635_s4 = inlined_call_operand.vmem [shape: f32[1,128], index: 4, kind: input, shape index: {}]   ;;  %s636_s5 = inlined_call_operand.vmem [shape: f32[1,128], index: 5, kind: input, shape index: {}]   ;;  %s637_s6 = inlined_call_operand.vmem [shape: f32[1,8], index: 6, kind: input, shape index: {}]   ;;  %s638_s7 = inlined_call_operand.hbm [shape: f32[8,8], index: 7, kind: output, shape index: {}]  }
   0x1   :  { %v440_v0 = vld [vmem:[%s632_s1] sm:$0xff]   ;;  %389 = vmatprep.subr.bf16.mxu0 %v486_v1  ;;  %v441_v2 = vld [vmem:[%s632_s1 + $0x8] sm:$0xff]   ;;  %397 = vmatprep.subr.bf16.mxu1 %v486_v1  ;;  %v444_v7 = vld [vmem:[%s633_s2 + $0x10] sm:$0xff]  }
   0x2   :  { %390 = vmatpush3.bf16.msra.mxu0 %v440_v0  ;;  %393 = vmatprep.mubr.msk.bf16.mxu0 %vm487_vm0, %v486_v1  ;;  %v28_v3 = vld [vmem:[%s631_s0] sm:$0xff]  ;;  %v443_v6 = vld [vmem:[%s633_s2 + $0x8] sm:$0xff]   ;;  %v445_v8 = vld [vmem:[%s633_s2 + $0x18] sm:$0xff]  }
   0x3   :  { %391 = vmatprep.subr.bf16.mxu0 %v486_v1  ;;  %v442_v4 = vld [vmem:[%s633_s2] sm:$0xff]   ;;  %413 = vmatprep.mubr.msk.bf16.mxu1 %vm487_vm0, %v486_v1  ;;  %v29_v5 = vpack.c.bf16 %v28_v3, %v28_v3 }
   0x4   :  { %398 = vmatpush3.bf16.msra.mxu1 %v442_v4 }
   0x5   :  { %399 = vmatprep.subr.bf16.mxu1 %v486_v1 }
   0x6   :  { %392 = vmatpush3.bf16.msra.mxu0 %v441_v2 }
   0x7   :  { %417 = vmatprep.subr.bf16.mxu0 %v486_v1 }
   0x8   :  { %400 = vmatpush3.bf16.msra.mxu1 %v443_v6 }
   0x9   :  { %394 = vmatmul.mubr.msk.bf16.vlgmr.msra.gmra.mrb[0].mxu0 %vm53_vm1, %v29_v5  ;;  %401 = vmatprep.subr.bf16.mxu1 %v486_v1 }
   0xa   :  { %433 = vmatprep.mubr.msk.bf16.mxu0 %vm487_vm0, %v486_v1 }
   0xc   :  { %402 = vmatpush3.bf16.msra.mxu1 %v444_v7 }
   0xd   :  { %403 = vmatprep.subr.bf16.mxu1 %v486_v1 }
   0xe   :  { %12 = vsyncpa [#allocation3], 0  ;;  %v446_v9 = vld [vmem:[%s633_s2 + $0x20] sm:$0xff]   ;;  %v447_v10 = vld [vmem:[%s633_s2 + $0x28] sm:$0xff]   ;;  %vm329_vm2 = vcmask 64512  }
   0xf   :  { %v448_v11 = vld [vmem:[%s633_s2 + $0x30] sm:$0xff]   ;;  %v449_v12 = vld [vmem:[%s633_s2 + $0x38] sm:$0xff]   ;;  %v450_v13 = vld [vmem:[%s634_s3] sm:$0xff]  }
  0x10   :  { %404 = vmatpush3.bf16.msra.mxu1 %v445_v8  ;;  %418 = vmatpush3.bf16.msra.mxu0 %v450_v13  ;;  %v451_v14 = vld [vmem:[%s634_s3 + $0x8] sm:$0xff]   ;;  %v452_v15 = vld [vmem:[%s634_s3 + $0x10] sm:$0xff]   ;;  %v453_v16 = vld [vmem:[%s634_s3 + $0x18] sm:$0xff]  }
  0x11   :  { %405 = vmatprep.subr.bf16.mxu1 %v486_v1  ;;  %419 = vmatprep.subr.bf16.mxu0 %v486_v1  ;;  %v454_v17 = vld [vmem:[%s634_s3 + $0x20] sm:$0xff]   ;;  %v455_v18 = vld [vmem:[%s634_s3 + $0x28] sm:$0xff]   ;;  %v456_v27 = vld [vmem:[%s634_s3 + $0x30] sm:$0xff]  }
  0x12   :  { %v345_v19 = vld [vmem:[%s635_s4] ss:$0 sm:$0xff]  ;;  %v457_v28 = vld [vmem:[%s634_s3 + $0x38] sm:$0xff]   ;;  %s488_s3 = smov [#allocation2]  }
  0x13   :  { %v349_v29 = vld [vmem:[%s636_s5] ss:$0 sm:$0xff]  ;;  %s337_s5 = sshll.u32 %s488_s3, 4  ;;  %s338_s5 = int_to_ptr.vmem [resolvable:$true] %s337_s5 }
  0x14   :  { %406 = vmatpush3.bf16.msra.mxu1 %v446_v9  ;;  %420 = vmatpush3.bf16.msra.mxu0 %v451_v14  ;;  %v358_v37 = vld [vmem:[%s637_s6] ss:$0 sm:$0xff]  ;;  %s462_s16 = scalar_lea.vmem %s338_s5, 128  ;;  %p467_p1 = scmp.lt.s32.totalorder %s338_s5, %s338_s5 }
  0x15   :  { %407 = vmatprep.subr.bf16.mxu1 %v486_v1  ;;  %421 = vmatprep.subr.bf16.mxu0 %v486_v1  ;;  %p463_p0 = scmp.ne.s32.totalorder %s338_s5, %s462_s16  ;;  %p468_p2 = scmp.lt.s32.totalorder %s462_s16, %s462_s16 }
  0x17   :  { %p469_p3 = por %p468_p2, %p467_p1 }
  0x18   :  { %408 = vmatpush3.bf16.msra.mxu1 %v447_v10  ;;  %422 = vmatpush3.bf16.msra.mxu0 %v452_v15 }
  0x19   :  { %409 = vmatprep.subr.bf16.mxu1 %v486_v1  ;;  %423 = vmatprep.subr.bf16.mxu0 %v486_v1  ;;  %p470_p4 = pnand %p469_p3, %p463_p0 }
  0x1c   :  { %410 = vmatpush3.bf16.msra.mxu1 %v448_v11  ;;  %424 = vmatpush3.bf16.msra.mxu0 %v453_v16 }
  0x1d   :  { %411 = vmatprep.subr.bf16.mxu1 %v486_v1  ;;  %425 = vmatprep.subr.bf16.mxu0 %v486_v1 }
  0x20   :  { %412 = vmatpush3.bf16.msra.mxu1 %v449_v12  ;;  %426 = vmatpush3.bf16.msra.mxu0 %v454_v17 }
  0x21   :  { %427 = vmatprep.subr.bf16.mxu0 %v486_v1 }
  0x24   :  { %428 = vmatpush3.bf16.msra.mxu0 %v455_v18 }
  0x25   :  { %429 = vmatprep.subr.bf16.mxu0 %v486_v1 }
  0x28   :  { %430 = vmatpush3.bf16.msra.mxu0 %v456_v27 }
  0x29   :  { %431 = vmatprep.subr.bf16.mxu0 %v486_v1 }
  0x2c   :  { %432 = vmatpush3.bf16.msra.mxu0 %v457_v28 }
  0xdc   :  { %v91_v20 = vpop.f32.mrb[0].mxu0 }
  0xdd   :  { %v92_v21 = vadd.f32 %v345_v19, %v91_v20  ;;  %v395_v22 = vpop.f32.mrb[1].mxu0 }
  0xde   :  { %v94_v23 = vpop.f32.mrb[2].mxu0 }
  0xdf   :  { %v97_v24 = vmax.f32 %v92_v21, 0.0  ;;  %v396_v25 = vpop.f32.mrb[3].mxu0 }
  0xe1   :  { %v98_v26 = vpack.c.bf16 %v97_v24, %v97_v24 }
  0xe3   :  { %414 = vmatmul.mubr.bf16.vlgmr.msra.gmra.mrb[0].mxu1 %v98_v26 }
 0x1b6   :  { %v204_v30 = vpop.f32.mrb[0].mxu1 }
 0x1b7   :  { %v205_v31 = vadd.f32 %v349_v29, %v204_v30  ;;  %v415_v32 = vpop.f32.mrb[1].mxu1 }
 0x1b8   :  { %v207_v33 = vpop.f32.mrb[2].mxu1 }
 0x1b9   :  { %v210_v34 = vmax.f32 %v205_v31, 0.0  ;;  %v416_v35 = vpop.f32.mrb[3].mxu1 }
 0x1bb   :  { %v211_v36 = vpack.c.bf16 %v210_v34, %v210_v34 }
 0x1bd   :  { %434 = vmatmul.mubr.bf16.vlgmr.msra.gmra.mrb[4].mxu0 %v211_v36 }
 0x290   :  { %v317_v38 = vpop.f32.mrb[4].mxu0 }
 0x291   :  { %v318_v39 = vadd.f32 %v358_v37, %v317_v38  ;;  %v435_v40 = vpop.f32.mrb[5].mxu0 }
 0x292   :  { %v320_v41 = vpop.f32.mrb[6].mxu0 }
 0x293   :  { %v367_v42 = vmul.f32 -1.442695, %v318_v39  ;;  %v436_v43 = vpop.f32.mrb[7].mxu0 }
 0x295   :  { %458 = vpow2.f32 %v367_v42 }
 0x29f   :  { %v459_v44 = vpop.eup %458 }
 0x2a0   :  { %v326_v45 = vadd.f32 1.0, %v459_v44 }
 0x2a2   :  { %460 = vrcp.f32 %v326_v45 }
 0x2ac   :  { %v461_v46 = vpop.eup %460 }
 0x2ad   :  { %330 = vst.msk [vmem:[#allocation2] sm:$0xff] %vm329_vm2, %v461_v46 }
 0x2ae   :  { %473 = shalt.err (!%p470_p4)
}
 0x2af   :  { %s474_s18 = scalar_lea.hbm %s638_s7, 128 }
 0x2b0   :  { %p475_p5 = scmp.ne.s32.totalorder %s638_s7, %s474_s18  ;;  %p478_p6 = scmp.lt.u32.totalorder %s474_s18, %s638_s7 }
 0x2b2   :  { %p480_p7 = pnand %p478_p6, %p475_p5 }
 0x2b4   :  { %483 = shalt.err (!%p480_p7)
}
 0x2b5   :  { %340 = dma.vmem_to_hbm [thread:$0]  %s338_s5, 128, %s638_s7, [#allocation3]  }
 0x2b6   :  { %484 = dma.done.wait [#allocation3], 128  }
 0x2b7   :  { %485 = vsyncadd [#allocation3], 4294967168 }
 0x2b8   :  { %344 = vsyncpa [#allocation3], 1 }

</bundles_post_ra>
